<compile_context>
chip_gen: v7x
topology: tpu7x:2x2x1
jax: 0.10.0
libtpu: 0.0.40
codegen_flags: <defaults>
</compile_context>

<pallas_src>
import functools

import jax
import jax.numpy as jnp
from jax.experimental import pallas as pl
from jax.experimental.pallas import tpu as pltpu

_LANE = 128


def _dice_sums_kernel(x_ref, t_ref, hsum_ref, htsum_ref, tsum_ref,
                      *, cols, tile_c, ragged):
    """Per-row partial sums of h = tanh(x/2), h*t and t.

    Grid: (row_tiles [parallel], col_tiles [arbitrary / reduction]).
    Output blocks are resident across the column axis and act as accumulators.
    """
    j = pl.program_id(1)
    last_j = pl.num_programs(1) - 1

    @pl.when(j == 0)
    def _():
        hsum_ref[...] = jnp.zeros_like(hsum_ref)
        htsum_ref[...] = jnp.zeros_like(htsum_ref)
        tsum_ref[...] = jnp.zeros_like(tsum_ref)

    x = x_ref[...].astype(jnp.float32)
    t = t_ref[...].astype(jnp.float32)

    # sigmoid(x) = 0.5 * (tanh(x/2) + 1): one EUP transcendental per element.
    # The *0.5/+1.0 affine is hoisted to the wrapper epilogue, so only the
    # tanh argument scale remains on the VPU here.
    h = jnp.tanh(0.5 * x)

    def accumulate(hv, tv):
        hsum_ref[...] += jnp.sum(hv, axis=1, keepdims=True)
        htsum_ref[...] += jnp.sum(hv * tv, axis=1, keepdims=True)
        tsum_ref[...] += jnp.sum(tv, axis=1, keepdims=True)

    if ragged:
        # Interior tiles: no masking at all (fast path).
        @pl.when(j < last_j)
        def _():
            accumulate(h, t)

        # Only the final column tile carries lanes past the true column count;
        # zero them (for h AND t) before accumulating so OOB garbage (even NaN)
        # cannot leak into the sums.
        @pl.when(j == last_j)
        def _():
            lane = jax.lax.broadcasted_iota(jnp.int32, h.shape, dimension=1)
            valid = (j * tile_c + lane) < cols
            accumulate(jnp.where(valid, h, 0.0), jnp.where(valid, t, 0.0))
    else:
        accumulate(h, t)


def _chip_budgets():
    """(target_block_bytes, vmem_limit_bytes) sized to the chip's VMEM."""
    vmem = None
    try:
        vmem = pltpu.get_tpu_info().vmem_capacity_bytes
    except Exception:
        pass
    if vmem is not None and vmem >= 96 * 1024 * 1024:
        # v5e / v6e: 128 MiB physical VMEM -> bigger blocks, higher limit.
        return 4 * 1024 * 1024, 64 * 1024 * 1024
    # v7x (64 MiB physical) or unknown: stay conservative.
    return 2 * 1024 * 1024, 32 * 1024 * 1024


def _pick_row_split(B, N):
    """Contiguous (free) row-split factor s: (B, N) -> (B*s, N//s).

    Goal: fill all 8 sublanes and reach >= 16 rows (two 8-row tiles) so the
    "parallel" grid axis can be sharded across both v7x TensorCores.
    """
    if B >= 16:
        return 1
    valid = [c for c in (2, 4, 8, 16) if N % c == 0 and (N // c) >= _LANE]
    if not valid:
        return 1
    for c in valid:                       # smallest split reaching 2 row tiles
        if B * c >= 16:
            return c
    return valid[-1]                      # otherwise at least fill sublanes


def dice_loss_pallas(logits, targets, smooth=1.0, *, target_block_bytes=None):
    """Dice loss.  logits/targets: (B, ...) in any dtype castable to f32.

    The kernel is HBM-bound on v5e/v6e: keep inputs in their narrowest storage
    dtype (e.g. bf16 logits, int8/bool targets); the f32 upcast happens in VMEM.
    """
    B = logits.shape[0]
    x2d = logits.reshape(B, -1)
    t2d = targets.reshape(B, -1)
    N = x2d.shape[1]

    s = _pick_row_split(B, N)
    rows, cols = B * s, N // s
    x = x2d.reshape(rows, cols)           # contiguous reshape: no HBM copy
    t = t2d.reshape(rows, cols)

    default_block_bytes, vmem_limit = _chip_budgets()
    if target_block_bytes is None:
        target_block_bytes = default_block_bytes

    itemsize = max(jnp.dtype(logits.dtype).itemsize,
                   jnp.dtype(targets.dtype).itemsize)
    cols_padded = pl.cdiv(cols, _LANE) * _LANE

    # Row block: start at 8 sublanes; for large-batch/small-N shapes grow in
    # multiples of 8 until a full-width block reaches ~target_block_bytes, but
    # keep >= 2 row tiles when rows permit (both v7x TensorCores stay busy).
    if rows < 8:
        row_block = rows                   # full dim satisfies the (8,128) rule
    else:
        max_rb = max(8, (rows // 2) // 8 * 8) if rows >= 16 else 8
        bytes_per_full_row = max(1, cols_padded * itemsize)
        want_rb = max(8, (target_block_bytes // bytes_per_full_row) // 8 * 8)
        row_block = min(want_rb, max_rb)

    # Column tile: multiple of 128 lanes, sized so each input block moves
    # ~target_block_bytes per grid step (hides the ~0.35 us/step overhead and
    # keeps the DMA near the HBM roofline), capped at the lane-rounded width.
    tile_c = max(_LANE,
                 (target_block_bytes // (row_block * itemsize)) // _LANE * _LANE)
    tile_c = min(tile_c, cols_padded)

    row_tiles = pl.cdiv(rows, row_block)
    col_tiles = pl.cdiv(cols, tile_c)
    ragged = (cols % tile_c) != 0

    kernel = functools.partial(_dice_sums_kernel, cols=cols, tile_c=tile_c,
                               ragged=ragged)

    sums_shape = jax.ShapeDtypeStruct((rows, 1), jnp.float32)
    out_spec = pl.BlockSpec((row_block, 1), lambda i, j: (i, 0))

    hsum, htsum, tsum = pl.pallas_call(
        kernel,
        out_shape=(sums_shape, sums_shape, sums_shape),
        grid_spec=pltpu.PrefetchScalarGridSpec(
            num_scalar_prefetch=0,
            grid=(row_tiles, col_tiles),
            in_specs=[
                pl.BlockSpec((row_block, tile_c), lambda i, j: (i, j)),
                pl.BlockSpec((row_block, tile_c), lambda i, j: (i, j)),
            ],
            out_specs=(out_spec, out_spec, out_spec),
        ),
        compiler_params=pltpu.CompilerParams(
            dimension_semantics=("parallel", "arbitrary"),
            vmem_limit_bytes=vmem_limit,
        ),
    )(x, t)

    # Tiny per-batch epilogue in plain JAX: fold the s sub-rows back into each
    # batch and undo the hoisted sigmoid affine (p = 0.5*h + 0.5).
    hsum = hsum.reshape(B, s).sum(axis=1)
    htsum = htsum.reshape(B, s).sum(axis=1)
    tsum = tsum.reshape(B, s).sum(axis=1)
    psum = 0.5 * hsum + 0.5 * jnp.float32(N)     # sum of sigmoid(x) per batch
    inter = 0.5 * htsum + 0.5 * tsum             # sum of sigmoid(x)*t per batch
    smooth = jnp.float32(smooth)
    dice = (2.0 * inter + smooth) / (psum + tsum + smooth)
    return 1.0 - jnp.mean(dice)


def dice_loss_ref(logits, targets, smooth=1.0):
    """Pure-JAX reference matching the PyTorch module."""
    B = logits.shape[0]
    probs = jax.nn.sigmoid(logits).astype(jnp.float32).reshape(B, -1)
    t = targets.astype(jnp.float32).reshape(B, -1)
    inter = jnp.sum(probs * t, axis=1)
    union = jnp.sum(probs, axis=1) + jnp.sum(t, axis=1)
    dice = (2.0 * inter + smooth) / (union + smooth)
    return 1.0 - jnp.mean(dice)


if __name__ == "__main__":
    key = jax.random.PRNGKey(0)
    ks = jax.random.split(key, 6)

    # Primary check: B=2, C=4, H=W=16 -> N=1024, row-split s=8, two row tiles
    # on the "parallel" axis.
    B, C, H, W = 2, 4, 16, 16
    logits = jax.random.normal(ks[0], (B, C, H, W), dtype=jnp.float32)
    targets = (jax.random.uniform(ks[1], (B, C, H, W)) > 0.5).astype(jnp.float32)
    loss = jax.block_until_ready(dice_loss_pallas(logits, targets, smooth=1.0))
    ref = dice_loss_ref(logits, targets, smooth=1.0)
    assert jnp.allclose(loss, ref, atol=1e-4, rtol=1e-4), (loss, ref)

    # Ragged check: N = 3*10*10 = 300 (not a multiple of 128) -> lane masking
    # on the last column tile only, no host-side padding copies.
    logits_r = jax.random.normal(ks[2], (2, 3, 10, 10), dtype=jnp.float32)
    targets_r = (jax.random.uniform(ks[3], (2, 3, 10, 10)) > 0.5).astype(jnp.float32)
    loss_r = jax.block_until_ready(dice_loss_pallas(logits_r, targets_r, smooth=1.0))
    ref_r = dice_loss_ref(logits_r, targets_r, smooth=1.0)
    assert jnp.allclose(loss_r, ref_r, atol=1e-4, rtol=1e-4), (loss_r, ref_r)

    # Large-batch / small-N check: exercises the adaptive row_block (>8) path
    # while still keeping two "parallel" row tiles.
    logits_b = jax.random.normal(ks[4], (32, 4, 8, 8), dtype=jnp.float32)
    targets_b = (jax.random.uniform(ks[5], (32, 4, 8, 8)) > 0.5).astype(jnp.float32)
    loss_b = jax.block_until_ready(dice_loss_pallas(logits_b, targets_b, smooth=1.0))
    ref_b = dice_loss_ref(logits_b, targets_b, smooth=1.0)
    assert jnp.allclose(loss_b, ref_b, atol=1e-4, rtol=1e-4), (loss_b, ref_b)

    print("KERNEL_OK")
</pallas_src>

<mosaic_0001>
module attributes {stable_mosaic.version = 11 : i64} {
  func.func @_dice_sums_kernel(%arg0: i32, %arg1: i32, %arg2: memref<8x128xf32, #tpu.memory_space<vmem>>, %arg3: memref<8x128xf32, #tpu.memory_space<vmem>>, %arg4: memref<8x1xf32, #tpu.memory_space<vmem>>, %arg5: memref<8x1xf32, #tpu.memory_space<vmem>>, %arg6: memref<8x1xf32, #tpu.memory_space<vmem>>) attributes {dimension_semantics = [#tpu.dimension_semantics<parallel>, #tpu.dimension_semantics<arbitrary>], iteration_bounds = array<i64: 2, 1>, scalar_prefetch = 0 : i64, scratch_operands = 0 : i64, tpu.core_type = #tpu.core_type<tc>, window_params = [{transform_indices = @transform_0, window_bounds = array<i64: 8, 128>}, {transform_indices = @transform_1, window_bounds = array<i64: 8, 128>}, {transform_indices = @transform_2, window_bounds = array<i64: 8, 1>}, {transform_indices = @transform_3, window_bounds = array<i64: 8, 1>}, {transform_indices = @transform_4, window_bounds = array<i64: 8, 1>}]} {
    %c0_i32 = arith.constant 0 : i32
    %0 = arith.cmpi eq, %arg1, %c0_i32 : i32
    %1 = arith.extui %0 : i1 to i32
    %c0_i32_0 = arith.constant 0 : i32
    %2 = arith.cmpi ne, %1, %c0_i32_0 : i32
    scf.if %2 {
      %cst_19 = arith.constant 0.000000e+00 : f32
      %24 = vector.broadcast %cst_19 : f32 to vector<8x1xf32>
      %c0_20 = arith.constant 0 : index
      %c0_21 = arith.constant 0 : index
      %25 = vector.load %arg4[%c0_20, %c0_21] : memref<8x1xf32, #tpu.memory_space<vmem>>, vector<8x1xf32>
      tpu.vector_store %arg4[%c0_20, %c0_21], %24 {strides = array<i32>} : memref<8x1xf32, #tpu.memory_space<vmem>>, vector<8x1xf32>,
      %cst_22 = arith.constant 0.000000e+00 : f32
      %26 = vector.broadcast %cst_22 : f32 to vector<8x1xf32>
      %c0_23 = arith.constant 0 : index
      %c0_24 = arith.constant 0 : index
      %27 = vector.load %arg5[%c0_23, %c0_24] : memref<8x1xf32, #tpu.memory_space<vmem>>, vector<8x1xf32>
      tpu.vector_store %arg5[%c0_23, %c0_24], %26 {strides = array<i32>} : memref<8x1xf32, #tpu.memory_space<vmem>>, vector<8x1xf32>,
      %cst_25 = arith.constant 0.000000e+00 : f32
      %28 = vector.broadcast %cst_25 : f32 to vector<8x1xf32>
      %c0_26 = arith.constant 0 : index
      %c0_27 = arith.constant 0 : index
      %29 = vector.load %arg6[%c0_26, %c0_27] : memref<8x1xf32, #tpu.memory_space<vmem>>, vector<8x1xf32>
      tpu.vector_store %arg6[%c0_26, %c0_27], %28 {strides = array<i32>} : memref<8x1xf32, #tpu.memory_space<vmem>>, vector<8x1xf32>,
    } else {
    }
    %c0 = arith.constant 0 : index
    %c0_1 = arith.constant 0 : index
    %3 = vector.load %arg2[%c0, %c0_1] : memref<8x128xf32, #tpu.memory_space<vmem>>, vector<8x128xf32>
    %c0_2 = arith.constant 0 : index
    %c0_3 = arith.constant 0 : index
    %4 = vector.load %arg3[%c0_2, %c0_3] : memref<8x128xf32, #tpu.memory_space<vmem>>, vector<8x128xf32>
    %cst = arith.constant 5.000000e-01 : f32
    %5 = vector.broadcast %cst : f32 to vector<8x128xf32>
    %6 = arith.mulf %5, %3 : vector<8x128xf32>
    %7 = math.tanh %6 : vector<8x128xf32>
    %c0_4 = arith.constant 0 : index
    %c0_5 = arith.constant 0 : index
    %8 = vector.load %arg4[%c0_4, %c0_5] : memref<8x1xf32, #tpu.memory_space<vmem>>, vector<8x1xf32>
    %cst_6 = arith.constant dense<0.000000e+00> : vector<8xf32>
    %9 = vector.multi_reduction <add>, %7, %cst_6 [1] : vector<8x128xf32> to vector<8xf32>
    %10 = vector.shape_cast %9 : vector<8xf32> to vector<8x1xf32>
    %11 = arith.addf %8, %10 : vector<8x1xf32>
    %c0_7 = arith.constant 0 : index
    %c0_8 = arith.constant 0 : index
    %12 = vector.load %arg4[%c0_7, %c0_8] : memref<8x1xf32, #tpu.memory_space<vmem>>, vector<8x1xf32>
    tpu.vector_store %arg4[%c0_7, %c0_8], %11 {strides = array<i32>} : memref<8x1xf32, #tpu.memory_space<vmem>>, vector<8x1xf32>,
    %c0_9 = arith.constant 0 : index
    %c0_10 = arith.constant 0 : index
    %13 = vector.load %arg5[%c0_9, %c0_10] : memref<8x1xf32, #tpu.memory_space<vmem>>, vector<8x1xf32>
    %14 = arith.mulf %7, %4 : vector<8x128xf32>
    %cst_11 = arith.constant dense<0.000000e+00> : vector<8xf32>
    %15 = vector.multi_reduction <add>, %14, %cst_11 [1] : vector<8x128xf32> to vector<8xf32>
    %16 = vector.shape_cast %15 : vector<8xf32> to vector<8x1xf32>
    %17 = arith.addf %13, %16 : vector<8x1xf32>
    %c0_12 = arith.constant 0 : index
    %c0_13 = arith.constant 0 : index
    %18 = vector.load %arg5[%c0_12, %c0_13] : memref<8x1xf32, #tpu.memory_space<vmem>>, vector<8x1xf32>
    tpu.vector_store %arg5[%c0_12, %c0_13], %17 {strides = array<i32>} : memref<8x1xf32, #tpu.memory_space<vmem>>, vector<8x1xf32>,
    %c0_14 = arith.constant 0 : index
    %c0_15 = arith.constant 0 : index
    %19 = vector.load %arg6[%c0_14, %c0_15] : memref<8x1xf32, #tpu.memory_space<vmem>>, vector<8x1xf32>
    %cst_16 = arith.constant dense<0.000000e+00> : vector<8xf32>
    %20 = vector.multi_reduction <add>, %4, %cst_16 [1] : vector<8x128xf32> to vector<8xf32>
    %21 = vector.shape_cast %20 : vector<8xf32> to vector<8x1xf32>
    %22 = arith.addf %19, %21 : vector<8x1xf32>
    %c0_17 = arith.constant 0 : index
    %c0_18 = arith.constant 0 : index
    %23 = vector.load %arg6[%c0_17, %c0_18] : memref<8x1xf32, #tpu.memory_space<vmem>>, vector<8x1xf32>
    tpu.vector_store %arg6[%c0_17, %c0_18], %22 {strides = array<i32>} : memref<8x1xf32, #tpu.memory_space<vmem>>, vector<8x1xf32>,
    return
  }
  func.func @transform_0(%arg0: i32, %arg1: i32) -> (i32, i32) {
    %c0_i32 = arith.constant 0 : i32
    return %arg0, %arg1 : i32, i32
  }
  func.func @transform_1(%arg0: i32, %arg1: i32) -> (i32, i32) {
    %c0_i32 = arith.constant 0 : i32
    return %arg0, %arg1 : i32, i32
  }
  func.func @transform_2(%arg0: i32, %arg1: i32) -> (i32, i32) {
    %c0_i32 = arith.constant 0 : i32
    %c0_i32_0 = arith.constant 0 : i32
    return %arg0, %c0_i32 : i32, i32
  }
  func.func @transform_3(%arg0: i32, %arg1: i32) -> (i32, i32) {
    %c0_i32 = arith.constant 0 : i32
    %c0_i32_0 = arith.constant 0 : i32
    return %arg0, %c0_i32 : i32, i32
  }
  func.func @transform_4(%arg0: i32, %arg1: i32) -> (i32, i32) {
    %c0_i32 = arith.constant 0 : i32
    %c0_i32_0 = arith.constant 0 : i32
    return %arg0, %c0_i32 : i32, i32
  }
}

</mosaic_0001>

<bundles_post_ra>
// kernel: tpu_custom_call.1
= control target key start
LH: loop header
LB: loop body
LE: loop exit
PB: predicated region body
PF: predicated region fallthrough
CT: control target
= control target key end

     0   :  { %10 = vsyncpa [#allocation3], 0  ;;  %s885_s0 = inlined_call_operand.hbm [shape: f32[16,128], index: 0, kind: input, shape index: {}]   ;;  %s886_s1 = inlined_call_operand.hbm [shape: f32[16,128], index: 1, kind: input, shape index: {}]   ;;  %s887_s2 = inlined_call_operand.vmem [shape: f32[16,1], index: 2, kind: output, shape index: {0}]   ;;  %s888_s3 = inlined_call_operand.vmem [shape: f32[16,1], index: 3, kind: output, shape index: {1}]   ;;  %s889_s4 = inlined_call_operand.vmem [shape: f32[16,1], index: 4, kind: output, shape index: {2}]  }
   0x1   :  { %12 = vsyncpa [#allocation3 + $0x1], 0 }
   0x2   :  { %13 = vsyncpa [#allocation5], 0 }
   0x3   :  { %15 = vsyncpa [#allocation5 + $0x1], 0  ;;  %s701_s15 = smov 0   ;;  %s703_s16 = smov 0  }
   0x4   :  { %s705_s17 = smov 0   ;;  %s707_s18 = smov 0  }
   0x5   :  { %s709_s19 = smov 0   ;;  %s711_s20 = smov 0  }
   0x6 LB: > { %s478_s21 = sadd.s32 4294967295, %s671_s20   ;;  %s33_s22 = sadd.s32 1, %s667_s19  ;;  %s671_s20 = sphi %s711_s20, %s21_s20   ;;  %s667_s19 = sphi %s709_s19, %s903_s19   ;;  %s663_s18 = sphi %s707_s18, %s902_s18   ;;  %s659_s17 = sphi %s705_s17, %s901_s17   ;;  %s655_s16 = sphi %s703_s16, %s900_s16   ;;  %s651_s15 = sphi %s701_s15, %s899_s15  }
   0x7   : > { %p35_p0 = scmp.ge.s32.totalorder %s33_s22, 2  ;;  %s42_s23 = sadd.s32 1, %s659_s17 }
   0x8   : > { %p49_p1 = scmp.ne.s32.totalorder %s659_s17, %s655_s16  ;;  %p50_p2 = scmp.eq.s32.totalorder %s671_s20, 0 }
   0x9   : > { %s905_s22 = smov (%p35_p0, %s33_s22), 0  ;;  %p55_p4 = scmp.ne.s32.totalorder %s655_s16, %s651_s15 }
   0xa   : > { %p737_p3 = por %p50_p2, %p49_p1  ;;  %s37_s25 = ssub.s32 %s667_s19, %s905_s22 }
   0xb   : > { %p56_p5 = scmp.eq.s32.totalorder %s478_s21, 0  ;;  %p40_p6 = scmp.eq.s32.totalorder %s37_s25, 0 }
   0xc   : > { %p505_p8 = scmp.lt.s32.totalorder %s671_s20, 2  ;;  %s753_s28 = sand.u32 1, %s659_s17  }
   0xd   : > { %p744_p7 = por %p56_p5, %p55_p4  ;;  %s483_s29 = sshll.u32 %s667_s19, 7 }
   0xe   : > { %s750_s27 = scalar_select %p40_p6, %s659_s17, %s42_s23  }
   0xf   : > { %s892_s26 = scalar_select %p744_p7, 1, 0 }
  0x10   : > { %s482_s30 = sshll.u32 %s753_s28, 3  ;;  %s762_s7 = scalar_lea.hbm %s885_s0, %s483_s29 }
  0x11   : > { %s189_s8 = scalar_lea.vmem [#allocation2], %s482_s30  ;;  %p768_p9 = pnand %p505_p8, %p737_p3 }
  0x12   : > { %s197_s9 = sshll.u32 %s189_s8, 4  ;;  %s186_s11 = scalar_lea.sflag [#allocation3], %s753_s28  ;;  %s772_s9 = int_to_ptr.vmem [resolvable:$true] %s197_s9 }
  0x13   : > { %s557_s12 = scalar_lea.hbm %s762_s7, 128  ;;  %p559_p13 = pneg %p768_p9 }
  0x14   : > { %p558_p12 = scmp.ne.s32.totalorder %s762_s7, %s557_s12  ;;  %s562_s15 = scalar_lea.hbm %s885_s0, 256 }
  0x15   : > { %p563_p2 = scmp.lt.u32.totalorder %s762_s7, %s885_s0  ;;  %p564_p3 = scmp.lt.u32.totalorder %s562_s15, %s557_s12 }
  0x16   : > { %p560_p0 = pnand %p559_p13, %p558_p12  ;;  %p566_p5 = scmp.lt.u32.totalorder %s557_s12, %s762_s7 }
  0x17   : > { %p565_p4 = por %p564_p3, %p563_p2 }
  0x18   : > { %p561_p1 = pneg %p560_p0 }
  0x19   : > { %p567_p6 = por %p566_p5, %p565_p4 }
  0x1b   : > { %p568_p8 = pnand %p567_p6, %p561_p1 }
  0x1d   : > { %571 = shalt.err (!%p568_p8)
}
  0x1e   : > { %s572_s24 = scalar_lea.vmem %s772_s9, 128  ;;  %s673_s25 = smov [#allocation2]  }
  0x1f   : > { %p573_p12 = scmp.ne.s32.totalorder %s772_s9, %s572_s24  ;;  %s577_s5 = sshll.u32 %s673_s25, 4  ;;  %s578_s5 = int_to_ptr.vmem [resolvable:$false] %s577_s5 }
  0x20   : > { %s579_s6 = scalar_lea.vmem %s578_s5, 256  ;;  %p580_p11 = scmp.lt.s32.totalorder %s772_s9, %s578_s5 }
  0x21   : > { %p575_p0 = pnand %p573_p12, %p559_p13  ;;  %p581_p2 = scmp.lt.s32.totalorder %s579_s6, %s572_s24 }
  0x23   : > { %p576_p10 = pneg %p575_p0  ;;  %p582_p3 = por %p581_p2, %p580_p11 }
  0x25   : > { %p583_p4 = pnand %p582_p3, %p576_p10 }
  0x27   : > { %586 = shalt.err (!%p583_p4)
}
  0x28   : > { %501 = dma.hbm_to_vmem [thread:$0]  (!%p768_p9), %s762_s7, 128, %s772_s9, %s186_s11  }
  0x29   : > { %p894_p1 = scmp.lt.s32.totalorder %s671_s20, 3  ;;  %p895_p5 = scmp.ge.s32.totalorder %s671_s20, 1 }
  0x2a   : > { %s815_s14 = scalar_lea.hbm %s886_s1, %s483_s29  ;;  %s208_s15 = scalar_lea.vmem [#allocation4], %s482_s30 }
  0x2b   : > { %p806_p6 = pnand %p895_p5, %p894_p1  ;;  %s216_s21 = sshll.u32 %s208_s15, 4  ;;  %s217_s21 = int_to_ptr.vmem [resolvable:$true] %s216_s21 }
  0x2c   : > { %s205_s7 = scalar_lea.sflag [#allocation5], %s753_s28  ;;  %s587_s9 = scalar_lea.hbm %s815_s14, 128 }
  0x2d   : > { %s896_s8 = scalar_select %p806_p6, 1, 0 }
  0x2e   : > { %p588_p10 = scmp.ne.s32.totalorder %s815_s14, %s587_s9  ;;  %s592_s29 = scalar_lea.hbm %s886_s1, 256 }
  0x2f   : > { %p593_p12 = scmp.lt.u32.totalorder %s815_s14, %s886_s1  ;;  %p594_p0 = scmp.lt.u32.totalorder %s592_s29, %s587_s9 }
  0x30   : > { %p590_p11 = pnand %p588_p10, %p559_p13  ;;  %p596_p3 = scmp.lt.u32.totalorder %s587_s9, %s815_s14 }
  0x31   : > { %p595_p2 = por %p594_p0, %p593_p12 }
  0x32   : > { %p591_p8 = pneg %p590_p11 }
  0x33   : > { %p597_p4 = por %p596_p3, %p595_p2 }
  0x35   : > { %p598_p1 = pnand %p597_p4, %p591_p8 }
  0x37   : > { %601 = shalt.err (!%p598_p1)
}
  0x38   : > { %s602_s28 = scalar_lea.vmem %s217_s21, 128  ;;  %s674_s30 = smov [#allocation4]  }
  0x39   : > { %p603_p5 = scmp.ne.s32.totalorder %s217_s21, %s602_s28  ;;  %s607_s5 = sshll.u32 %s674_s30, 4  ;;  %s608_s5 = int_to_ptr.vmem [resolvable:$false] %s607_s5 }
  0x3a   : > { %s609_s6 = scalar_lea.vmem %s608_s5, 256  ;;  %p610_p7 = scmp.lt.s32.totalorder %s217_s21, %s608_s5 }
  0x3b   : > { %p605_p10 = pnand %p603_p5, %p559_p13  ;;  %p611_p6 = scmp.lt.s32.totalorder %s609_s6, %s602_s28 }
  0x3d   : > { %p606_p11 = pneg %p605_p10  ;;  %p612_p0 = por %p611_p6, %p610_p7 }
  0x3f   : > { %p613_p12 = pnand %p612_p0, %p606_p11 }
  0x41   : > { %616 = shalt.err (!%p613_p12)
}
  0x42   : > { %504 = dma.hbm_to_vmem [thread:$0]  (!%p768_p9), %s815_s14, 128, %s217_s21, %s205_s7  }
  0x43   : > { %p897_p8 = scmp.ne.s32.totalorder %s896_s8, 0 }
  0x44   : > { %s227_s12 = sand.u32 (!%p897_p8), 1, %s655_s16   ;;  %p898_p13 = scmp.ne.s32.totalorder (!%p897_p8), %s892_s26, 0 }
  0x45   : > { %225 = sbr.rel (%p897_p8) target bundleno = 242 (0xf2), region = 28  ;;  %s487_s13 = sshll.u32 (!%p897_p8), %s227_s12, 3 }
  0x46   : > { %s228_s15 = scalar_lea.sflag (!%p897_p8), [#allocation3], %s227_s12  ;;  %s231_s9 = scalar_lea.vmem (!%p897_p8), [#allocation2], %s487_s13 }
  0x4c   : > { %642 = dma.done.wait (%p898_p13), %s228_s15, 128  }
  0x4d   : > { %644 = vsyncadd (%p898_p13), %s228_s15, 4294967168  ;;  %s237_s11 = scalar_lea.sflag [#allocation5], %s227_s12  ;;  %s240_s23 = scalar_lea.vmem [#allocation4], %s487_s13 }
  0x4e   : > { %646 = dma.done.wait (%p898_p13), %s237_s11, 128  }
  0x4f   : > { %648 = vsyncadd (%p898_p13), %s237_s11, 4294967168  ;;  %p277_p7 = scmp.lt.s32.totalorder %s663_s18, 1  ;;  %vm293_vm0 = vcmask 7168   ;;  %v675_v0 = vmov 0.0   ;;  %v297_v1 = vld [vmem:[%s231_s9] sm:$0xff]  ;;  %v298_v2 = vld [vmem:[%s240_s23] sm:$0xff] }
  0x50   : > { %v299_v3 = vmul.f32 0.5, %v297_v1  ;;  %314 = vadd.xlane.f32.xlu1 %v298_v2 }
  0x51   : > { %s907_s18 = smov (!%p277_p7, %s663_s18), 1 }
  0x52   : > { %s489_s10 = sshll.u32 %s907_s18, 3  ;;  %555 = vtanh.f32 %v299_v3 }
  0x53   : > { %s280_s21 = scalar_lea.vmem %s887_s2, %s489_s10  ;;  %s288_s18 = scalar_lea.vmem %s889_s4, %s489_s10 }
  0x54   : > { %294 = vst.msk [vmem:[%s280_s21] sm:$0xff] %vm293_vm0, %v675_v0  ;;  %s284_s25 = scalar_lea.vmem %s888_s3, %s489_s10  ;;  %296 = vst.msk [vmem:[%s288_s18] sm:$0xff] %vm293_vm0, %v675_v0 }
  0x55   : > { %295 = vst.msk [vmem:[%s284_s25] sm:$0xff] %vm293_vm0, %v675_v0 }
  0x5b   : > { %v313_v6 = vld [vmem:[%s288_s18] sm:$0xff] }
  0x5c   : > { %v556_v4 = vpop.eup %555  ;;  %v301_v9 = vld [vmem:[%s280_s21] sm:$0xff] }
  0x5d   : > { %302 = vadd.xlane.f32.xlu0 %v556_v4  ;;  %v308_v5 = vmul.f32 %v556_v4, %v298_v2  ;;  %v307_v12 = vld [vmem:[%s284_s25] sm:$0xff] }
  0x61   : > { %309 = vadd.xlane.f32.xlu0 %v308_v5 }
  0xdd   : > { %v315_v7 = vpop.xlane.xlu1 %314 }
  0xde   : > { %v316_v8 = vadd.f32 %v315_v7, %v313_v6 }
  0xe0   : > { %317 = vst.msk [vmem:[%s288_s18] sm:$0xff] %vm293_vm0, %v316_v8 }
  0xea   : > { %v303_v10 = vpop.xlane.xlu0 %302 }
  0xeb   : > { %v304_v11 = vadd.f32 %v303_v10, %v301_v9 }
  0xed   : > { %306 = vst.msk [vmem:[%s280_s21] sm:$0xff] %vm293_vm0, %v304_v11 }
  0xee   : > { %v310_v13 = vpop.xlane.xlu0 %309 }
  0xef   : > { %v311_v14 = vadd.f32 %v310_v13, %v307_v12 }
  0xf1   : > { %312 = vst.msk [vmem:[%s284_s25] sm:$0xff] %vm293_vm0, %v311_v14 }
  0xf2 PF: > { %s21_s20 = sadd.s32 1, %s671_s20   ;;  %s899_s15 = smov %s655_s16 }
  0xf3   : > { %p18_p9 = scmp.ge.s32.totalorder %s21_s20, 4   ;;  %s900_s16 = smov %s659_s17 }
  0xf4   : > { %s901_s17 = smov %s750_s27  ;;  %s902_s18 = smov %s667_s19 }
  0xf5   : > { %s903_s19 = smov %s905_s22  ;;  %20 = sbr.rel (!%p18_p9) target bundleno = 6 (0x6), region = 109 }
  0xfc   :  { %365 = vsyncpa [#allocation3], 1 }
  0xfd   :  { %367 = vsyncpa [#allocation3 + $0x1], 1 }
  0xfe   :  { %368 = vsyncpa [#allocation5], 1 }
  0xff   :  { %370 = vsyncpa [#allocation5 + $0x1], 1 }

</bundles_post_ra>
